<compile_context>
chip_gen: v5e
topology: v5e:2x2
jax: 0.10.0
libtpu: 0.0.40
codegen_flags: <defaults>
</compile_context>

<pallas_src>
import math

import jax
import jax.numpy as jnp
from jax.experimental import pallas as pl
from jax.experimental.pallas import tpu as pltpu

NUM_H3 = 100   # in_features of linear4
DOUT = 10      # out_features of linear4
MAX_TB = 8192  # batch tile (rows); multiple of 8; ~3.2 MiB f32 raw per tile


def _linear_logsoftmax_kernel(x_ref, w_ref, b_ref, o_ref):
    # Cast to f32 in-kernel (matches x.float() in the spec); free under DMA.
    x = x_ref[...].astype(jnp.float32)                       # (TB, 100)

    # MXU matmul with the pre-transposed weight: (TB,100) @ (100,10) -> (TB,10)
    logits = jnp.dot(x, w_ref[...], preferred_element_type=jnp.float32)
    logits = logits + b_ref[...]                              # + (1, 10)

    # Numerically stable log_softmax along the feature (last) axis.
    m = jnp.max(logits, axis=-1, keepdims=True)               # XLU (cheap, 10 lanes)
    shifted = logits - m
    p = jnp.exp(shifted)                                      # EUP
    # Sum-of-exp via the (idle) MXU instead of a second XLU lane reduction.
    denom = jnp.dot(p, jnp.ones((DOUT, 1), jnp.float32),
                    preferred_element_type=jnp.float32)        # (TB, 1)
    o_ref[...] = (shifted - jnp.log(denom)).astype(o_ref.dtype)


def forward_h3_dout_forward(x, weight, bias):
    """Pallas equivalent of the PyTorch forward.

    x:      (..., NUM_H3)  -- flattened to (B, NUM_H3); cast to f32 in-kernel
    weight: (DOUT, NUM_H3) -- PyTorch nn.Linear convention
    bias:   (DOUT,)
    returns (B, DOUT) float32 log-probabilities
    """
    x2 = jnp.reshape(x, (-1, NUM_H3))          # keep native dtype
    B = x2.shape[0]

    # Tile selection: full batch when it fits (block == full dim is always
    # legal), otherwise 8192-row tiles (multiple of 8); the last block may be
    # ragged -- Pallas masks its writes, so no wrapper pad / slice is needed.
    tb = B if B <= MAX_TB else MAX_TB
    grid = (pl.cdiv(B, tb),)

    # One-time ~4 KiB transpose so the kernel contracts on the canonical axis.
    w_t = jnp.transpose(weight).astype(jnp.float32)           # (NUM_H3, DOUT)
    b2 = jnp.reshape(bias, (1, DOUT)).astype(jnp.float32)     # (1, DOUT)

    cost = pl.CostEstimate(
        flops=2 * B * NUM_H3 * DOUT + 2 * B * DOUT + 6 * B * DOUT,
        transcendentals=2 * B * DOUT,                          # exp + log
        bytes_accessed=(x2.dtype.itemsize * B * NUM_H3
                        + 4 * (NUM_H3 * DOUT + DOUT + B * DOUT)),
    )

    return pl.pallas_call(
        _linear_logsoftmax_kernel,
        out_shape=jax.ShapeDtypeStruct((B, DOUT), jnp.float32),
        grid=grid,
        in_specs=[
            pl.BlockSpec((tb, NUM_H3), lambda i: (i, 0)),      # x tile (pipelined)
            pl.BlockSpec((NUM_H3, DOUT), lambda i: (0, 0)),    # weight (resident)
            pl.BlockSpec((1, DOUT), lambda i: (0, 0)),         # bias   (resident)
        ],
        out_specs=pl.BlockSpec((tb, DOUT), lambda i: (i, 0)),
        compiler_params=pltpu.CompilerParams(
            dimension_semantics=("parallel",),                 # megacore on v7x
            vmem_limit_bytes=32 * 1024 * 1024,                 # 8192-row tiles x2 bufs
        ),
        cost_estimate=cost,
    )(x2, w_t, b2)


def init_params(key):
    """Deterministic init matching nn.Linear default U(-1/sqrt(fan_in), +)."""
    kw, kb = jax.random.split(key)
    bound = 1.0 / math.sqrt(NUM_H3)
    weight = jax.random.uniform(kw, (DOUT, NUM_H3), jnp.float32,
                                minval=-bound, maxval=bound)
    bias = jax.random.uniform(kb, (DOUT,), jnp.float32,
                              minval=-bound, maxval=bound)
    return weight, bias


if __name__ == "__main__":
    key = jax.random.PRNGKey(0)
    kp, kx = jax.random.split(key)

    weight, bias = init_params(kp)

    # Small example input consistent with the module: (batch=8, num_h3=100).
    x = jax.random.normal(kx, (8, NUM_H3), jnp.float32)

    out = forward_h3_dout_forward(x, weight, bias)
    out = jax.block_until_ready(out)

    # Sanity check against a plain-JAX reference.
    ref = jax.nn.log_softmax(x.astype(jnp.float32) @ weight.T + bias, axis=1)
    assert out.shape == (8, DOUT)
    assert jnp.allclose(out, ref, atol=1e-5, rtol=1e-5)

    print("KERNEL_OK")
</pallas_src>

<mosaic_0001>
module attributes {stable_mosaic.version = 11 : i64} {
  func.func @_linear_logsoftmax_kernel(%arg0: i32, %arg1: memref<8x100xf32, #tpu.memory_space<vmem>>, %arg2: memref<100x10xf32, #tpu.memory_space<vmem>>, %arg3: memref<1x10xf32, #tpu.memory_space<vmem>>, %arg4: memref<8x10xf32, #tpu.memory_space<vmem>>) attributes {dimension_semantics = [#tpu.dimension_semantics<parallel>], iteration_bounds = array<i64: 1>, scalar_prefetch = 0 : i64, scratch_operands = 0 : i64, tpu.core_type = #tpu.core_type<tc>, window_params = [{transform_indices = @transform_0, window_bounds = array<i64: 8, 100>}, {pipeline_mode = #tpu.pipeline_mode<synchronous>, transform_indices = @transform_1, window_bounds = array<i64: 100, 10>}, {pipeline_mode = #tpu.pipeline_mode<synchronous>, transform_indices = @transform_2, window_bounds = array<i64: 1, 10>}, {transform_indices = @transform_3, window_bounds = array<i64: 8, 10>}]} {
    %c0 = arith.constant 0 : index
    %c0_0 = arith.constant 0 : index
    %0 = vector.load %arg1[%c0, %c0_0] : memref<8x100xf32, #tpu.memory_space<vmem>>, vector<8x100xf32>
    %c0_1 = arith.constant 0 : index
    %c0_2 = arith.constant 0 : index
    %1 = vector.load %arg2[%c0_1, %c0_2] : memref<100x10xf32, #tpu.memory_space<vmem>>, vector<100x10xf32>
    %cst = arith.constant dense<0.000000e+00> : vector<8x10xf32>
    %2 = tpu.matmul %0, %1, %cst {dimension_numbers = #tpu.dot_dimension_numbers<[1], [0], [0], [1], [0, 0, 1, 1], [], []>} : vector<8x100xf32>, vector<100x10xf32>, vector<8x10xf32> -> vector<8x10xf32>
    %c0_3 = arith.constant 0 : index
    %c0_4 = arith.constant 0 : index
    %3 = vector.load %arg3[%c0_3, %c0_4] : memref<1x10xf32, #tpu.memory_space<vmem>>, vector<1x10xf32>
    %4 = vector.broadcast %3 : vector<1x10xf32> to vector<8x10xf32>
    %5 = arith.addf %2, %4 : vector<8x10xf32>
    %cst_5 = arith.constant dense<0xFF800000> : vector<8xf32>
    %6 = vector.multi_reduction <maximumf>, %5, %cst_5 [1] : vector<8x10xf32> to vector<8xf32>
    %7 = vector.shape_cast %6 : vector<8xf32> to vector<8x1xf32>
    %8 = vector.broadcast %7 : vector<8x1xf32> to vector<8x10xf32>
    %9 = arith.subf %5, %8 : vector<8x10xf32>
    %10 = math.exp %9 : vector<8x10xf32>
    %cst_6 = arith.constant 1.000000e+00 : f32
    %11 = vector.broadcast %cst_6 : f32 to vector<10x1xf32>
    %cst_7 = arith.constant dense<0.000000e+00> : vector<8x1xf32>
    %12 = tpu.matmul %10, %11, %cst_7 {dimension_numbers = #tpu.dot_dimension_numbers<[1], [0], [0], [1], [0, 0, 1, 1], [], []>} : vector<8x10xf32>, vector<10x1xf32>, vector<8x1xf32> -> vector<8x1xf32>
    %13 = math.log %12 : vector<8x1xf32>
    %14 = vector.broadcast %13 : vector<8x1xf32> to vector<8x10xf32>
    %15 = arith.subf %9, %14 : vector<8x10xf32>
    %c0_8 = arith.constant 0 : index
    %c0_9 = arith.constant 0 : index
    %16 = vector.load %arg4[%c0_8, %c0_9] : memref<8x10xf32, #tpu.memory_space<vmem>>, vector<8x10xf32>
    tpu.vector_store %arg4[%c0_8, %c0_9], %15 {strides = array<i32>} : memref<8x10xf32, #tpu.memory_space<vmem>>, vector<8x10xf32>,
    return
  }
  func.func @transform_0(%arg0: i32) -> (i32, i32) {
    %c0_i32 = arith.constant 0 : i32
    %c0_i32_0 = arith.constant 0 : i32
    return %arg0, %c0_i32 : i32, i32
  }
  func.func @transform_1(%arg0: i32) -> (i32, i32) {
    %c0_i32 = arith.constant 0 : i32
    %c0_i32_0 = arith.constant 0 : i32
    %c0_i32_1 = arith.constant 0 : i32
    return %c0_i32, %c0_i32_0 : i32, i32
  }
  func.func @transform_2(%arg0: i32) -> (i32, i32) {
    %c0_i32 = arith.constant 0 : i32
    %c0_i32_0 = arith.constant 0 : i32
    %c0_i32_1 = arith.constant 0 : i32
    return %c0_i32, %c0_i32_0 : i32, i32
  }
  func.func @transform_3(%arg0: i32) -> (i32, i32) {
    %c0_i32 = arith.constant 0 : i32
    %c0_i32_0 = arith.constant 0 : i32
    return %arg0, %c0_i32 : i32, i32
  }
}

</mosaic_0001>

<bundles_post_ra>
// kernel: tpu_custom_call.1
= control target key start
LH: loop header
LB: loop body
LE: loop exit
PB: predicated region body
PF: predicated region fallthrough
CT: control target
= control target key end

     0   :  { %vm37_vm0 = vcmask 1043456   ;;  %s233_s0 = inlined_call_operand.vmem [shape: f32[8,100], index: 0, kind: input, shape index: {}]   ;;  %s234_s1 = inlined_call_operand.vmem [shape: f32[100,10], index: 1, kind: input, shape index: {}]   ;;  %s235_s2 = inlined_call_operand.vmem [shape: f32[1,10], index: 2, kind: input, shape index: {}]   ;;  %s236_s3 = inlined_call_operand.hbm [shape: f32[8,10], index: 3, kind: output, shape index: {}]  }
   0x1   :  { %v28_v0 = vld [vmem:[%s234_s1 + $0x60] sm:$0xf]  ;;  %v27_v1 = vld [vmem:[%s234_s1 + $0x58] sm:$0xff]  ;;  %v26_v2 = vld [vmem:[%s234_s1 + $0x50] sm:$0xff] }
   0x2   :  { %120 = vmatpush.msk.msra.mxu0 %vm37_vm0, %v28_v0  ;;  %v25_v3 = vld [vmem:[%s234_s1 + $0x48] sm:$0xff] }
   0x4   :  { %45 = vmatpush.msra.mxu0 %v27_v1 }
   0x6   :  { %46 = vmatpush.msra.mxu0 %v26_v2 }
   0x7   :  { %8 = vsyncpa [#allocation3], 0  ;;  %v24_v4 = vld [vmem:[%s234_s1 + $0x40] sm:$0xff]  ;;  %v23_v5 = vld [vmem:[%s234_s1 + $0x38] sm:$0xff]  ;;  %vm33_vm1 = vcmask 818176   ;;  %vm61_vm2 = vcmask 80896  }
   0x8   :  { %47 = vmatpush.msra.mxu0 %v25_v3  ;;  %v22_v6 = vld [vmem:[%s234_s1 + $0x30] sm:$0xff]  ;;  %v21_v7 = vld [vmem:[%s234_s1 + $0x28] sm:$0xff]  ;;  %v20_v8 = vld [vmem:[%s234_s1 + $0x20] sm:$0xff]  ;;  %vm71_vm3 = vcmask 1041408   ;;  %v159_v18 = vmov 1.0   ;;  %v160_v23 = vmov 0  }
   0x9   :  { %v19_v9 = vld [vmem:[%s234_s1 + $0x18] sm:$0xff]  ;;  %v18_v10 = vld [vmem:[%s234_s1 + $0x10] sm:$0xff]  ;;  %v17_v11 = vld [vmem:[%s234_s1 + $0x8] sm:$0xff]  ;;  %122 = vmatpush.msk.msra.mxu1 %vm71_vm3, %v159_v18  ;;  %127 = vset.pattern.permute.xlu0 %v160_v23  ;;  %s111_s16 = sshll.u32 %s236_s3, 4  ;;  %s112_s16 = int_to_ptr.hbm [resolvable:$true] %s111_s16 }
   0xa   :  { %48 = vmatpush.msra.mxu0 %v24_v4  ;;  %v16_v12 = vld [vmem:[%s234_s1] sm:$0xff] }
   0xb   :  { %v15_v13 = vld [vmem:[%s233_s0] sm:$0xff]  ;;  %90 = vmatpush.msra.mxu1 %v159_v18  ;;  %s161_s0 = smov [#allocation2]  }
   0xc   :  { %49 = vmatpush.msra.mxu0 %v23_v5  ;;  %v128_v14 = vld [vmem:[%s235_s2] ss:$0 sm:$0xff]  ;;  %s109_s1 = sshll.u32 %s161_s0, 4  ;;  %s110_s1 = int_to_ptr.vmem [resolvable:$true] %s109_s1 }
   0xe   :  { %50 = vmatpush.msra.mxu0 %v22_v6 }
  0x10   :  { %51 = vmatpush.msra.mxu0 %v21_v7 }
  0x12   :  { %52 = vmatpush.msra.mxu0 %v20_v8 }
  0x14   :  { %53 = vmatpush.msra.mxu0 %v19_v9 }
  0x16   :  { %54 = vmatpush.msra.mxu0 %v18_v10 }
  0x18   :  { %55 = vmatpush.msra.mxu0 %v17_v11 }
  0x1a   :  { %56 = vmatpush.msra.mxu0 %v16_v12 }
  0x1b   :  { %121 = vmatmul.msk.f32.vlgmr.msra.gmra.mxu0 %vm33_vm1, %v15_v13 }
  0x98   :  { %v58_v15 = vpop.f32.mrf.mxu0 }
  0x99   :  { %v59_v16 = vadd.f32 %v128_v14, %v58_v15 }
  0x9b   :  { %v62_v17 = vsel %vm61_vm2, %v59_v16, -inf }
  0x9c   :  { %63 = vmax.xlane.f32.xlu0 %v62_v17 }
 0x10f   :  { %v64_v19 = vpop.xlane.xlu0 %63 }
 0x110   :  { %v65_v20 = vsub.f32 %v59_v16, %v64_v19 }
 0x112   :  { %v66_v21 = vmul.f32 1.442695, %v65_v20 }
 0x114   :  { %129 = vpow2.f32 %v66_v21 }
 0x11a   :  { %v130_v22 = vpop.eup %129 }
 0x11b   :  { %123 = vmatmul.msk.f32.vlgmr.msra.gmra.mxu1 %vm61_vm2, %v130_v22 }
 0x198   :  { %v92_v24 = vpop.f32.mrf.mxu1 }
 0x199   :  { %131 = vlog2.f32 %v92_v24 }
 0x19f   :  { %v132_v25 = vpop.eup %131 }
 0x1a0   :  { %v96_v26 = vmul.f32 0.6931472, %v132_v25 }
 0x1a2   :  { %99 = vperm.xlu0 %127, %v96_v26  }
 0x214   :  { %v100_v27 = vpop.permute.xlu0 %99 }
 0x215   :  { %v102_v28 = vsub.f32 %v65_v20, %v100_v27 }
 0x217   :  { %103 = vst.msk [vmem:[#allocation2] sm:$0xff] %vm61_vm2, %v102_v28 }
 0x218   :  { %114 = dma.vmem_to_hbm [thread:$0]  %s110_s1, 128, %s112_s16, [#allocation3]  }
 0x219   :  { %157 = dma.done.wait [#allocation3], 128  }
 0x21a   :  { %158 = vsyncadd [#allocation3], 4294967168 }
 0x21b   :  { %119 = vsyncpa [#allocation3], 1 }

</bundles_post_ra>
